<compile_context>
chip_gen: v7x
topology: tpu7x:2x2x1
jax: 0.10.0
libtpu: 0.0.40
codegen_flags: <defaults>
</compile_context>

<pallas_src>
import functools

import jax
import jax.numpy as jnp
import numpy as np
from jax.experimental import pallas as pl
from jax.experimental.pallas import tpu as pltpu

_ROWS_PER_DENSE_ROW = 32                      # 32 rows x 4 cols = 128 lanes
_PAD_GRANULE = 8 * _ROWS_PER_DENSE_ROW        # dense rows come out a multiple of 8


def make_buoyancy_G(rho_water: float, grav_acc: float, displacement: float,
                    metacentric_height: float) -> jax.Array:
    """Builds the fixed restoring-force matrix exactly as Buoyancy.__init__ does."""
    g = jnp.zeros((4, 4), dtype=jnp.float32)
    return g.at[2, 2].set(rho_water * grav_acc * displacement * metacentric_height)


def _round_up(x: int, m: int) -> int:
    return ((x + m - 1) // m) * m


# ---------------------------------------------------------------- kernels ---

def _buoyancy_diag_kernel(pos_ref, scale_ref, out_ref):
    # pos_ref: (TB, 128) f32, scale_ref: (1, 128) f32 resident, out_ref: (TB, 128).
    # Diagonal G on the lane-dense view degenerates to a per-lane scale (pure VPU,
    # exact f32, HBM-streaming roofline).
    out_ref[...] = pos_ref[...] * scale_ref[...]


def _buoyancy_mxu_kernel(pos_ref, gblk_ref, out_ref):
    # pos_ref: (TB, 128) f32, gblk_ref: (128, 128) resident block-diag kron(I_32, G).
    # One f32 MXU matmul mixes every 4-lane group by G without cross-lane shuffles.
    out_ref[...] = jnp.dot(pos_ref[...], gblk_ref[...],
                           preferred_element_type=jnp.float32)


# ----------------------------------------------------------- pallas paths ---

def _lane_dense(position, tile_rows):
    """Pad B to the alignment granule and reshape (B, 4) -> (R, 128) for free."""
    b = position.shape[0]
    # Cast only if needed (no extra HBM pass for the common f32 case).
    pos = position if position.dtype == jnp.float32 else position.astype(jnp.float32)
    padded_b = _round_up(max(b, _PAD_GRANULE), _PAD_GRANULE)
    if padded_b != b:
        pos = jnp.pad(pos, ((0, padded_b - b), (0, 0)))
    r = padded_b // _ROWS_PER_DENSE_ROW
    pos128 = pos.reshape(r, 128)               # contiguous row-major: free reshape
    tb = min(_round_up(tile_rows, 8), r)       # multiple of 8 sublanes, <= R
    return pos128, r, tb, padded_b


@functools.partial(jax.jit, static_argnames=("tile_rows",))
def _buoyancy_pallas_diag(position, scale_row, *, tile_rows):
    b = position.shape[0]
    pos128, r, tb, padded_b = _lane_dense(position, tile_rows)
    out128 = pl.pallas_call(
        _buoyancy_diag_kernel,
        out_shape=jax.ShapeDtypeStruct((r, 128), jnp.float32),
        grid=(pl.cdiv(r, tb),),
        in_specs=[
            pl.BlockSpec((tb, 128), lambda i: (i, 0)),   # lane-dense position tile
            pl.BlockSpec((1, 128), lambda i: (0, 0)),    # resident diag(G) row
        ],
        out_specs=pl.BlockSpec((tb, 128), lambda i: (i, 0)),
        compiler_params=pltpu.CompilerParams(dimension_semantics=("parallel",)),
    )(pos128, scale_row)
    out = out128.reshape(padded_b, 4)
    return out[:b] if padded_b != b else out


@functools.partial(jax.jit, static_argnames=("tile_rows",))
def _buoyancy_pallas_general(position, G, *, tile_rows):
    b = position.shape[0]
    pos128, r, tb, padded_b = _lane_dense(position, tile_rows)
    # Resident 128x128 block-diagonal mix matrix: kron(I_32, G), f32.
    g_block = jnp.kron(jnp.eye(_ROWS_PER_DENSE_ROW, dtype=jnp.float32),
                       G.astype(jnp.float32))
    out128 = pl.pallas_call(
        _buoyancy_mxu_kernel,
        out_shape=jax.ShapeDtypeStruct((r, 128), jnp.float32),
        grid=(pl.cdiv(r, tb),),
        in_specs=[
            pl.BlockSpec((tb, 128), lambda i: (i, 0)),
            pl.BlockSpec((128, 128), lambda i: (0, 0)),  # resident block-diag G
        ],
        out_specs=pl.BlockSpec((tb, 128), lambda i: (i, 0)),
        compiler_params=pltpu.CompilerParams(dimension_semantics=("parallel",)),
    )(pos128, g_block)
    out = out128.reshape(padded_b, 4)
    return out[:b] if padded_b != b else out


# -------------------------------------------------------------- dispatcher ---

def _static_diag(G):
    """diag(G) as numpy if G is concrete and diagonal, else None (general path)."""
    if isinstance(G, jax.core.Tracer):
        return None
    g = np.asarray(G)
    if g.shape != (4, 4):
        return None
    if np.count_nonzero(g - np.diag(np.diag(g))) == 0:
        return np.diag(g).astype(np.float32)
    return None


def buoyancy_forward(position, G, *, tile_rows: int = 4096,
                     min_pallas_batch: int = 65536, force_pallas: bool = False):
    """tau_hs = position @ G  for position (B, 4) and G (4, 4) (torch.mm semantics)."""
    b, k = position.shape
    assert k == 4 and G.shape == (4, 4)
    diag = _static_diag(G)

    if b < min_pallas_batch and not force_pallas:
        # Tiny problem: let XLA fuse it; a pallas_call launch would dominate.
        pos = position.astype(jnp.float32)
        if diag is not None:
            return pos * jnp.asarray(diag, jnp.float32)[None, :]
        return jnp.einsum("bk,kn->bn", pos, G.astype(jnp.float32),
                          precision=jax.lax.Precision.HIGHEST)

    if diag is not None:
        scale_row = jnp.asarray(
            np.tile(diag, _ROWS_PER_DENSE_ROW).reshape(1, 128), dtype=jnp.float32)
        return _buoyancy_pallas_diag(position, scale_row, tile_rows=tile_rows)
    return _buoyancy_pallas_general(position, G, tile_rows=tile_rows)


if __name__ == "__main__":
    # Deterministic physical constants (stand-ins for the module's __init__ args).
    rho_water = 1025.0
    grav_acc = 9.81
    displacement = 0.5
    metacentric_height = 0.25
    G = make_buoyancy_G(rho_water, grav_acc, displacement, metacentric_height)

    key = jax.random.PRNGKey(0)
    k0, k1, k2, k3 = jax.random.split(key, 4)

    def reference(pos, g):
        # Exact-f32 broadcast multiply-add reference of torch.mm(position, G).
        return (pos.astype(jnp.float32)[:, :, None]
                * g.astype(jnp.float32)[None, :, :]).sum(axis=1)

    # 1) Small batch -> XLA fast path (Pallas launch not worth it at this size).
    pos_small = jax.random.normal(k0, (12, 4), dtype=jnp.float32)
    out_small = jax.block_until_ready(buoyancy_forward(pos_small, G))
    assert out_small.shape == (12, 4)
    assert jnp.allclose(out_small, reference(pos_small, G), atol=1e-4, rtol=1e-5)

    # 2) Pallas diagonal fast path: lane-dense tile + batch padding (1000 -> 1024).
    pos_a = jax.random.normal(k1, (1000, 4), dtype=jnp.float32)
    out_a = jax.block_until_ready(buoyancy_forward(pos_a, G, force_pallas=True))
    assert out_a.shape == (1000, 4)
    assert jnp.allclose(out_a, reference(pos_a, G), atol=1e-4, rtol=1e-5)

    # 3) Pallas diagonal path with a multi-step grid and a ragged last block.
    pos_b = jax.random.normal(k2, (3000, 4), dtype=jnp.float32)
    out_b = jax.block_until_ready(
        buoyancy_forward(pos_b, G, tile_rows=64, force_pallas=True))
    assert out_b.shape == (3000, 4)
    assert jnp.allclose(out_b, reference(pos_b, G), atol=1e-4, rtol=1e-5)

    # 4) General (non-diagonal) G -> resident block-diagonal MXU path, f32 exact-ish.
    G_dense = jax.random.normal(k3, (4, 4), dtype=jnp.float32)
    out_c = jax.block_until_ready(
        buoyancy_forward(pos_a, G_dense, force_pallas=True))
    assert out_c.shape == (1000, 4)
    assert jnp.allclose(out_c, reference(pos_a, G_dense), atol=1e-4, rtol=1e-5)

    print("KERNEL_OK")
</pallas_src>

<mosaic_0001>
module attributes {stable_mosaic.version = 11 : i64} {
  func.func @_buoyancy_diag_kernel(%arg0: i32, %arg1: memref<32x128xf32, #tpu.memory_space<vmem>>, %arg2: memref<1x128xf32, #tpu.memory_space<vmem>>, %arg3: memref<32x128xf32, #tpu.memory_space<vmem>>) attributes {dimension_semantics = [#tpu.dimension_semantics<parallel>], iteration_bounds = array<i64: 1>, scalar_prefetch = 0 : i64, scratch_operands = 0 : i64, tpu.core_type = #tpu.core_type<tc>, window_params = [{transform_indices = @transform_0, window_bounds = array<i64: 32, 128>}, {pipeline_mode = #tpu.pipeline_mode<synchronous>, transform_indices = @transform_1, window_bounds = array<i64: 1, 128>}, {transform_indices = @transform_2, window_bounds = array<i64: 32, 128>}]} {
    %c0 = arith.constant 0 : index
    %c0_0 = arith.constant 0 : index
    %0 = vector.load %arg1[%c0, %c0_0] : memref<32x128xf32, #tpu.memory_space<vmem>>, vector<32x128xf32>
    %c0_1 = arith.constant 0 : index
    %c0_2 = arith.constant 0 : index
    %1 = vector.load %arg2[%c0_1, %c0_2] : memref<1x128xf32, #tpu.memory_space<vmem>>, vector<1x128xf32>
    %2 = vector.broadcast %1 : vector<1x128xf32> to vector<32x128xf32>
    %3 = arith.mulf %0, %2 : vector<32x128xf32>
    %c0_3 = arith.constant 0 : index
    %c0_4 = arith.constant 0 : index
    %4 = vector.load %arg3[%c0_3, %c0_4] : memref<32x128xf32, #tpu.memory_space<vmem>>, vector<32x128xf32>
    tpu.vector_store %arg3[%c0_3, %c0_4], %3 {strides = array<i32>} : memref<32x128xf32, #tpu.memory_space<vmem>>, vector<32x128xf32>,
    return
  }
  func.func @transform_0(%arg0: i32) -> (i32, i32) {
    %c0_i32 = arith.constant 0 : i32
    %c0_i32_0 = arith.constant 0 : i32
    return %arg0, %c0_i32 : i32, i32
  }
  func.func @transform_1(%arg0: i32) -> (i32, i32) {
    %c0_i32 = arith.constant 0 : i32
    %c0_i32_0 = arith.constant 0 : i32
    %c0_i32_1 = arith.constant 0 : i32
    return %c0_i32, %c0_i32_0 : i32, i32
  }
  func.func @transform_2(%arg0: i32) -> (i32, i32) {
    %c0_i32 = arith.constant 0 : i32
    %c0_i32_0 = arith.constant 0 : i32
    return %arg0, %c0_i32 : i32, i32
  }
}

</mosaic_0001>

<bundles_post_ra>
// kernel: _buoyancy_pallas_diag.1
= control target key start
LH: loop header
LB: loop body
LE: loop exit
PB: predicated region body
PF: predicated region fallthrough
CT: control target
= control target key end

     0   :  { %s77_s0 = inlined_call_operand.vmem [shape: f32[32,128], index: 0, kind: input, shape index: {}]   ;;  %s78_s1 = inlined_call_operand.vmem [shape: f32[1,128], index: 1, kind: input, shape index: {}]   ;;  %s79_s2 = inlined_call_operand.vmem [shape: f32[32,128], index: 2, kind: output, shape index: {}]  }
   0x1   :  { %v11_v0 = vld [vmem:[%s77_s0] sm:$0xff]  ;;  %v12_v2 = vld [vmem:[%s77_s0 + $0x8] sm:$0xff]  ;;  %v13_v5 = vld [vmem:[%s77_s0 + $0x10] sm:$0xff] }
   0x2   :  { %v34_v1 = vld [vmem:[%s78_s1] ss:$0 sm:$0xff]  ;;  %v14_v6 = vld [vmem:[%s77_s0 + $0x18] sm:$0xff] }
   0x3   :  { %v22_v3 = vmul.f32 %v34_v1, %v11_v0  ;;  %v23_v4 = vmul.f32 %v34_v1, %v12_v2  ;;  %v24_v7 = vmul.f32 %v34_v1, %v13_v5  ;;  %v25_v8 = vmul.f32 %v34_v1, %v14_v6 }
   0x5   :  { %26 = vst [vmem:[%s79_s2] sm:$0xff] %v22_v3  ;;  %27 = vst [vmem:[%s79_s2 + $0x8] sm:$0xff] %v23_v4 }
   0x6   :  { %28 = vst [vmem:[%s79_s2 + $0x10] sm:$0xff] %v24_v7  ;;  %29 = vst [vmem:[%s79_s2 + $0x18] sm:$0xff] %v25_v8 }

</bundles_post_ra>
